<compile_context>
chip_gen: v7x
topology: tpu7x:2x2x1
jax: 0.10.0
libtpu: 0.0.40
codegen_flags: <defaults>
</compile_context>

<pallas_src>
import functools

import jax
import jax.numpy as jnp
from jax.experimental import pallas as pl
from jax.experimental.pallas import tpu as pltpu

MARGIN = 1.0
LANE = 128          # vreg lane width
SUBLANES = 8        # vreg sublane count
MAX_TILE_ROWS = 2048  # (2048,128) f32 = 1 MiB/tile; 2 inputs x 2 bufs = 4 MiB VMEM


def _round_up(x, m):
    return (x + m - 1) // m * m


def _hinge_loss_kernel(x_ref, t_ref, out_ref, acc_ref, *, inv_count):
    i = pl.program_id(1)                      # reduction axis (innermost)

    @pl.when(i == 0)
    def _init():
        acc_ref[...] = jnp.zeros_like(acc_ref)

    # Stream native dtype; do the math in f32 on the VPU.
    x = x_ref[...].astype(jnp.float32)
    t = t_ref[...].astype(jnp.float32)
    hinge = jnp.maximum(MARGIN - x * t, 0.0)

    # Fold the (tile_rows, 128) tile into the small (8, 128) accumulator.
    # Reshape splits the sublane axis exactly on (8,128) tile boundaries, so
    # the sum over axis 0 is plain elementwise vreg adds (pure VALU, hidden
    # under the memory bound).
    acc_ref[...] += hinge.reshape(-1, SUBLANES, LANE).sum(axis=0)

    @pl.when(i == pl.num_programs(1) - 1)
    def _finalize():
        # Lane-dense (8,128) partial, already scaled by 1/N; the final tiny
        # cross-lane reduce happens in the wrapper.
        out_ref[...] = acc_ref[...] * inv_count


def hinge_loss(x, t):
    """Pallas implementation of HingeLoss.forward(input, target)."""
    assert x.shape == t.shape, "input and target must have the same shape"
    n = x.size
    assert n > 0

    xf = jnp.reshape(x, (-1,))
    tf = jnp.reshape(t, (-1,))

    rows = pl.cdiv(n, LANE)
    # Use 2 chunks (both v7x TensorCores) only when there is enough work;
    # small inputs get a single chunk -> a single (or few) grid step(s).
    num_chunks = 2 if rows > MAX_TILE_ROWS else 1
    tile_rows = min(MAX_TILE_ROWS,
                    _round_up(pl.cdiv(rows, num_chunks), SUBLANES))
    steps = pl.cdiv(rows, num_chunks * tile_rows)
    rows_padded = num_chunks * steps * tile_rows

    pad = rows_padded * LANE - n
    if pad:
        # Neutral padding: x*t >= margin  =>  clamp(margin - x*t, 0) == 0,
        # so padded elements contribute nothing to the sum.
        xf = jnp.pad(xf, (0, pad), constant_values=MARGIN + 1.0)
        tf = jnp.pad(tf, (0, pad), constant_values=1)

    x2 = xf.reshape(rows_padded, LANE)
    t2 = tf.reshape(rows_padded, LANE)

    kernel = functools.partial(_hinge_loss_kernel, inv_count=1.0 / n)
    in_map = lambda c, i: (c * steps + i, 0)

    partials = pl.pallas_call(
        kernel,
        out_shape=jax.ShapeDtypeStruct((num_chunks * SUBLANES, LANE),
                                       jnp.float32),
        grid_spec=pltpu.PrefetchScalarGridSpec(
            num_scalar_prefetch=0,
            grid=(num_chunks, steps),
            in_specs=[
                pl.BlockSpec((tile_rows, LANE), in_map),
                pl.BlockSpec((tile_rows, LANE), in_map),
            ],
            out_specs=pl.BlockSpec((SUBLANES, LANE), lambda c, i: (c, 0)),
            scratch_shapes=[pltpu.VMEM((SUBLANES, LANE), jnp.float32)],
        ),
        compiler_params=pltpu.CompilerParams(
            dimension_semantics=("parallel", "arbitrary")),
    )(x2, t2)

    # Tiny final reduce of the lane-dense partials (at most 2*8*128 floats).
    return jnp.sum(partials)


def _reference_hinge_loss(x, t):
    return jnp.mean(jnp.maximum(MARGIN - x.astype(jnp.float32)
                                * t.astype(jnp.float32), 0.0))


if __name__ == "__main__":
    key = jax.random.PRNGKey(0)
    kx, kt = jax.random.split(key)

    # Small NCHW-style shapes; total elements = 2*4*16*16 = 2048.
    shape = (2, 4, 16, 16)
    x = jax.random.normal(kx, shape, dtype=jnp.float32)
    t = jnp.where(jax.random.uniform(kt, shape) > 0.5, 1.0, -1.0)
    t = t.astype(jnp.float32)

    loss = hinge_loss(x, t)
    jax.block_until_ready(loss)
    ref = _reference_hinge_loss(x, t)
    assert jnp.allclose(loss, ref, rtol=1e-5, atol=1e-6), (loss, ref)

    # Also exercise the ragged/padded path (element count not a multiple of
    # 8*128) to confirm the old hard assert is no longer needed.
    x2 = jax.random.normal(kx, (3, 5, 7), dtype=jnp.float32)
    t2 = jnp.where(jax.random.uniform(kt, (3, 5, 7)) > 0.5, 1.0, -1.0)
    t2 = t2.astype(jnp.float32)
    loss2 = hinge_loss(x2, t2)
    jax.block_until_ready(loss2)
    ref2 = _reference_hinge_loss(x2, t2)
    assert jnp.allclose(loss2, ref2, rtol=1e-5, atol=1e-6), (loss2, ref2)

    print("KERNEL_OK")
</pallas_src>

<mosaic_0001>
module attributes {stable_mosaic.version = 11 : i64} {
  func.func @_hinge_loss_kernel(%arg0: i32, %arg1: i32, %arg2: memref<16x128xf32, #tpu.memory_space<vmem>>, %arg3: memref<16x128xf32, #tpu.memory_space<vmem>>, %arg4: memref<8x128xf32, #tpu.memory_space<vmem>>, %arg5: memref<8x128xf32, #tpu.memory_space<vmem>>) attributes {dimension_semantics = [#tpu.dimension_semantics<parallel>, #tpu.dimension_semantics<arbitrary>], iteration_bounds = array<i64: 1, 1>, scalar_prefetch = 0 : i64, scratch_operands = 1 : i64, tpu.core_type = #tpu.core_type<tc>, window_params = [{transform_indices = @transform_0, window_bounds = array<i64: 16, 128>}, {transform_indices = @transform_1, window_bounds = array<i64: 16, 128>}, {transform_indices = @transform_2, window_bounds = array<i64: 8, 128>}]} {
    %c0_i32 = arith.constant 0 : i32
    %0 = arith.cmpi eq, %arg1, %c0_i32 : i32
    %1 = arith.extui %0 : i1 to i32
    %c0_i32_0 = arith.constant 0 : i32
    %2 = arith.cmpi ne, %1, %c0_i32_0 : i32
    scf.if %2 {
      %cst_12 = arith.constant 0.000000e+00 : f32
      %18 = vector.broadcast %cst_12 : f32 to vector<8x128xf32>
      %c0_13 = arith.constant 0 : index
      %c0_14 = arith.constant 0 : index
      %19 = vector.load %arg5[%c0_13, %c0_14] : memref<8x128xf32, #tpu.memory_space<vmem>>, vector<8x128xf32>
      tpu.vector_store %arg5[%c0_13, %c0_14], %18 {strides = array<i32>} : memref<8x128xf32, #tpu.memory_space<vmem>>, vector<8x128xf32>,
    } else {
    }
    %c0 = arith.constant 0 : index
    %c0_1 = arith.constant 0 : index
    %3 = vector.load %arg2[%c0, %c0_1] : memref<16x128xf32, #tpu.memory_space<vmem>>, vector<16x128xf32>
    %c0_2 = arith.constant 0 : index
    %c0_3 = arith.constant 0 : index
    %4 = vector.load %arg3[%c0_2, %c0_3] : memref<16x128xf32, #tpu.memory_space<vmem>>, vector<16x128xf32>
    %5 = arith.mulf %3, %4 : vector<16x128xf32>
    %cst = arith.constant 1.000000e+00 : f32
    %6 = vector.broadcast %cst : f32 to vector<16x128xf32>
    %7 = arith.subf %6, %5 : vector<16x128xf32>
    %cst_4 = arith.constant 0.000000e+00 : f32
    %8 = vector.broadcast %cst_4 : f32 to vector<16x128xf32>
    %9 = arith.maximumf %7, %8 : vector<16x128xf32>
    %c0_5 = arith.constant 0 : index
    %c0_6 = arith.constant 0 : index
    %10 = vector.load %arg5[%c0_5, %c0_6] : memref<8x128xf32, #tpu.memory_space<vmem>>, vector<8x128xf32>
    %11 = vector.shape_cast %9 : vector<16x128xf32> to vector<2x8x128xf32>
    %cst_7 = arith.constant dense<0.000000e+00> : vector<8x128xf32>
    %12 = vector.multi_reduction <add>, %11, %cst_7 [0] : vector<2x8x128xf32> to vector<8x128xf32>
    %13 = arith.addf %10, %12 : vector<8x128xf32>
    %c0_8 = arith.constant 0 : index
    %c0_9 = arith.constant 0 : index
    %14 = vector.load %arg5[%c0_8, %c0_9] : memref<8x128xf32, #tpu.memory_space<vmem>>, vector<8x128xf32>
    tpu.vector_store %arg5[%c0_8, %c0_9], %13 {strides = array<i32>} : memref<8x128xf32, #tpu.memory_space<vmem>>, vector<8x128xf32>,
    %c0_i32_10 = arith.constant 0 : i32
    %15 = arith.cmpi eq, %arg1, %c0_i32_10 : i32
    %16 = arith.extui %15 : i1 to i32
    %c0_i32_11 = arith.constant 0 : i32
    %17 = arith.cmpi ne, %16, %c0_i32_11 : i32
    scf.if %17 {
      %c0_12 = arith.constant 0 : index
      %c0_13 = arith.constant 0 : index
      %18 = vector.load %arg5[%c0_12, %c0_13] : memref<8x128xf32, #tpu.memory_space<vmem>>, vector<8x128xf32>
      %cst_14 = arith.constant 4.8828125E-4 : f32
      %19 = vector.broadcast %cst_14 : f32 to vector<8x128xf32>
      %20 = arith.mulf %18, %19 : vector<8x128xf32>
      %c0_15 = arith.constant 0 : index
      %c0_16 = arith.constant 0 : index
      %21 = vector.load %arg4[%c0_15, %c0_16] : memref<8x128xf32, #tpu.memory_space<vmem>>, vector<8x128xf32>
      tpu.vector_store %arg4[%c0_15, %c0_16], %20 {strides = array<i32>} : memref<8x128xf32, #tpu.memory_space<vmem>>, vector<8x128xf32>,
    } else {
    }
    return
  }
  func.func @transform_0(%arg0: i32, %arg1: i32) -> (i32, i32) {
    %c1_i32 = arith.constant 1 : i32
    %0 = arith.muli %arg0, %c1_i32 : i32
    %1 = arith.addi %0, %arg1 : i32
    %c0_i32 = arith.constant 0 : i32
    %c0_i32_0 = arith.constant 0 : i32
    return %1, %c0_i32 : i32, i32
  }
  func.func @transform_1(%arg0: i32, %arg1: i32) -> (i32, i32) {
    %c1_i32 = arith.constant 1 : i32
    %0 = arith.muli %arg0, %c1_i32 : i32
    %1 = arith.addi %0, %arg1 : i32
    %c0_i32 = arith.constant 0 : i32
    %c0_i32_0 = arith.constant 0 : i32
    return %1, %c0_i32 : i32, i32
  }
  func.func @transform_2(%arg0: i32, %arg1: i32) -> (i32, i32) {
    %c0_i32 = arith.constant 0 : i32
    %c0_i32_0 = arith.constant 0 : i32
    return %arg0, %c0_i32 : i32, i32
  }
}

</mosaic_0001>

<bundles_post_ra>
// kernel: tpu_custom_call.1
= control target key start
LH: loop header
LB: loop body
LE: loop exit
PB: predicated region body
PF: predicated region fallthrough
CT: control target
= control target key end

     0   :  { %7 = vsyncpa [#allocation4], 0  ;;  %s226_s0 = inlined_call_operand.hbm [shape: f32[16,128], index: 0, kind: input, shape index: {}]   ;;  %s227_s1 = inlined_call_operand.hbm [shape: f32[16,128], index: 1, kind: input, shape index: {}]   ;;  %s228_s2 = inlined_call_operand.hbm [shape: f32[8,128], index: 2, kind: output, shape index: {}]  }
   0x1   :  { %8 = vsyncpa [#allocation7], 0 }
   0x2   :  { %9 = vsyncpa [#allocation5], 0  ;;  %s170_s9 = smov [#allocation3]   ;;  %s98_s13 = scalar_lea.hbm %s226_s0, 256 }
   0x3   :  { %s19_s10 = sshll.u32 %s170_s9, 4  ;;  %p99_p0 = scmp.ne.s32.totalorder %s226_s0, %s98_s13  ;;  %s20_s10 = int_to_ptr.vmem [resolvable:$true] %s19_s10 }
   0x4   :  { %p102_p1 = scmp.lt.u32.totalorder %s98_s13, %s226_s0 }
   0x6   :  { %p104_p2 = pnand %p102_p1, %p99_p0 }
   0x8   :  { %107 = shalt.err (!%p104_p2)
}
   0x9   :  { %s108_s18 = scalar_lea.vmem %s20_s10, 256  ;;  %p113_p4 = scmp.lt.s32.totalorder %s20_s10, %s20_s10 }
   0xa   :  { %p109_p3 = scmp.ne.s32.totalorder %s20_s10, %s108_s18  ;;  %p114_p5 = scmp.lt.s32.totalorder %s108_s18, %s108_s18 }
   0xc   :  { %p115_p6 = por %p114_p5, %p113_p4 }
   0xe   :  { %p116_p7 = pnand %p115_p6, %p109_p3 }
  0x10   :  { %119 = shalt.err (!%p116_p7)
}
  0x11   :  { %s171_s19 = smov 128   ;;  %s172_s20 = smov 8  }
  0x12   :  { %25 = dma.hbm_to_vmem [thread:$0]  %s226_s0, 256, %s20_s10, [#allocation4], %s171_s19, %s171_s19, %s172_s20  }
  0x13   :  { %s173_s23 = smov [#allocation6]   ;;  %s120_s27 = scalar_lea.hbm %s227_s1, 256 }
  0x14   :  { %s35_s24 = sshll.u32 %s173_s23, 4  ;;  %p121_p8 = scmp.ne.s32.totalorder %s227_s1, %s120_s27  ;;  %s36_s24 = int_to_ptr.vmem [resolvable:$true] %s35_s24 }
  0x15   :  { %p124_p9 = scmp.lt.u32.totalorder %s120_s27, %s227_s1 }
  0x17   :  { %p126_p10 = pnand %p124_p9, %p121_p8 }
  0x19   :  { %129 = shalt.err (!%p126_p10)
}
  0x1a   :  { %s130_s4 = scalar_lea.vmem %s36_s24, 256  ;;  %p135_p12 = scmp.lt.s32.totalorder %s36_s24, %s36_s24 }
  0x1b   :  { %p131_p11 = scmp.ne.s32.totalorder %s36_s24, %s130_s4  ;;  %p136_p13 = scmp.lt.s32.totalorder %s130_s4, %s130_s4 }
  0x1d   :  { %p137_p0 = por %p136_p13, %p135_p12 }
  0x1f   :  { %p138_p1 = pnand %p137_p0, %p131_p11 }
  0x21   :  { %141 = shalt.err (!%p138_p1)
}
  0x22   :  { %41 = dma.hbm_to_vmem [thread:$0]  %s227_s1, 256, %s36_s24, [#allocation7], %s171_s19, %s171_s19, %s172_s20  }
  0x23   :  { %164 = dma.done.wait [#allocation4], 256  }
  0x24   :  { %165 = vsyncadd [#allocation4], 4294967040 }
  0x25   :  { %166 = dma.done.wait [#allocation7], 256  }
  0x26   :  { %167 = vsyncadd [#allocation7], 4294967040  ;;  %v57_v0 = vld [vmem:[#allocation3] sm:$0xff]  ;;  %v58_v1 = vld [vmem:[#allocation3 + $0x8] sm:$0xff]  ;;  %s174_s6 = smov [#allocation8]  }
  0x27   :  { %v59_v2 = vld [vmem:[#allocation6] sm:$0xff]  ;;  %v60_v3 = vld [vmem:[#allocation6 + $0x8] sm:$0xff]  ;;  %s83_s7 = sshll.u32 %s174_s6, 4  ;;  %s84_s7 = int_to_ptr.vmem [resolvable:$true] %s83_s7 }
  0x28   :  { %v61_v4 = vmul.f32 %v59_v2, %v57_v0  ;;  %v62_v5 = vmul.f32 %v60_v3, %v58_v1  ;;  %s142_s1 = scalar_lea.vmem %s84_s7, 128  ;;  %p147_p3 = scmp.lt.s32.totalorder %s84_s7, %s84_s7 }
  0x29   :  { %p143_p2 = scmp.ne.s32.totalorder %s84_s7, %s142_s1  ;;  %p148_p4 = scmp.lt.s32.totalorder %s142_s1, %s142_s1 }
  0x2a   :  { %v63_v6 = vsub.f32 1.0, %v61_v4  ;;  %v64_v7 = vsub.f32 1.0, %v62_v5 }
  0x2b   :  { %p149_p5 = por %p148_p4, %p147_p3 }
  0x2c   :  { %v65_v8 = vmax.f32 %v63_v6, 0.0  ;;  %v66_v9 = vmax.f32 %v64_v7, 0.0 }
  0x2d   :  { %p150_p6 = pnand %p149_p5, %p143_p2 }
  0x2e   :  { %v68_v10 = vadd.f32 %v66_v9, %v65_v8 }
  0x30   :  { %v75_v11 = vmul.f32 0.00048828125, %v68_v10 }
  0x32   :  { %76 = vst [vmem:[#allocation8] sm:$0xff] %v75_v11 }
  0x33   :  { %153 = shalt.err (!%p150_p6)
}
  0x34   :  { %s154_s10 = scalar_lea.hbm %s228_s2, 128 }
  0x35   :  { %p155_p7 = scmp.ne.s32.totalorder %s228_s2, %s154_s10  ;;  %p158_p8 = scmp.lt.u32.totalorder %s154_s10, %s228_s2 }
  0x37   :  { %p160_p9 = pnand %p158_p8, %p155_p7 }
  0x39   :  { %163 = shalt.err (!%p160_p9)
}
  0x3a   :  { %86 = dma.vmem_to_hbm [thread:$0]  %s84_s7, 128, %s228_s2, [#allocation5]  }
  0x3b   :  { %168 = dma.done.wait [#allocation5], 128  }
  0x3c   :  { %169 = vsyncadd [#allocation5], 4294967168 }
  0x3d   :  { %90 = vsyncpa [#allocation4], 1 }
  0x3e   :  { %91 = vsyncpa [#allocation7], 1 }
  0x3f   :  { %92 = vsyncpa [#allocation5], 1 }

</bundles_post_ra>
